<compile_context>
chip_gen: v6e
topology: v6e:2x2x1
jax: 0.10.0
libtpu: 0.0.40
codegen_flags: <defaults>
</compile_context>

<pallas_src>
import functools

import jax
import jax.numpy as jnp
from jax import lax
from jax.experimental import pallas as pl
from jax.experimental.pallas import tpu as pltpu

EPS = 1e-5


def _round_up(x, m):
    return (x + m - 1) // m * m


def _vmem_capacity_bytes():
    """Per-core VMEM capacity; conservative fallback if the query fails."""
    try:
        return int(pltpu.get_tpu_info().vmem_capacity_bytes)
    except Exception:
        return 64 << 20  # v7x per-TensorCore VMEM (smallest of v5e/v6e/v7x)


def _has_low_precision_vpu():
    """True on chips with a native bf16 VALU (v6e / v7x); False on v5e and older."""
    try:
        kind = jax.devices()[0].device_kind.lower()
    except Exception:
        return False
    return not any(tag in kind for tag in ("v2", "v3", "v4", "v5"))


def _adain_kernel(x_ref, w_ref, b_ref, o_ref, *, eps, low_precision_ew):
    # x_ref: (tile_c, HW) in the input dtype
    # w_ref, b_ref: (tile_c, 1) f32 blocks for THIS grid step (no resident slab)
    #
    # NOTE: for the final (partial) grid block, rows past B*C hold unspecified
    # data; all math here is strictly per-row, and the out-of-bounds rows of
    # o_ref are discarded on writeback, so they are harmless. Do NOT add any
    # cross-row reduction here without masking those rows first.
    inv_hw = jnp.float32(1.0 / x_ref.shape[-1])

    # Pass 1: mean. Re-read from the VMEM ref so no full-tile f32 stays live.
    mean = jnp.sum(x_ref[...].astype(jnp.float32), axis=-1, keepdims=True) * inv_hw

    # Pass 2: mean-shifted (two-pass) biased variance -- avoids the
    # E[x^2] - E[x]^2 cancellation of the one-pass formulation.
    d = x_ref[...].astype(jnp.float32) - mean
    var = jnp.sum(d * d, axis=-1, keepdims=True) * inv_hw

    inv_std = lax.rsqrt(var + eps)
    scale = inv_std * w_ref[...]             # (tile_c, 1)
    shift = b_ref[...] - mean * scale        # (tile_c, 1)

    # Pass 3: single FMA per element, re-reading x from VMEM.
    if low_precision_ew:
        # bf16 VALU path (v6e / v7x): packed 16x128 vregs, 2x elements per op.
        o_ref[...] = x_ref[...] * scale.astype(o_ref.dtype) + shift.astype(o_ref.dtype)
    else:
        o_ref[...] = (x_ref[...].astype(jnp.float32) * scale + shift).astype(o_ref.dtype)


def _footprint_bytes(tile_c, hw, itemsize):
    """Estimated VMEM footprint for one grid step (with double buffering)."""
    block = tile_c * hw * itemsize
    io = 2 * 2 * block                                # x in + out, double-buffered
    wb = 2 * 2 * _round_up(tile_c, 8) * 128 * 4       # (tile_c,1) f32 pads lanes to 128
    f32_tmp = 2 * tile_c * hw * 4                     # peak transient f32 tiles in-kernel
    return io + wb + f32_tmp + (4 << 20)              # + compiler scratch headroom


def _choose_tile_c(bc, hw, itemsize, *, block_budget_bytes=4 << 20,
                   min_block_bytes=1 << 20, min_grid=8):
    """Largest sublane-aligned channel tile at ~block_budget_bytes per input block.

    The min_grid clamp (pipeline / megacore work) is only applied as long as it
    does not shrink blocks below ~min_block_bytes: fewer, fatter steps win for
    this HBM-bound kernel (measured mem-bound roofline drops sharply for small
    tiles due to the ~0.35 us per-step overhead).
    """
    align = 8 if itemsize >= 4 else 16      # f32 packs 8 sublanes, bf16 packs 16
    if bc <= align:
        return bc                            # one full-extent block is always legal
    row_bytes = max(hw * itemsize, 1)
    tile = max(align, (block_budget_bytes // row_bytes // align) * align)
    rows_for_grid = _round_up(pl.cdiv(bc, min_grid), align)
    rows_for_min_block = _round_up(pl.cdiv(min_block_bytes, row_bytes), align)
    tile = min(tile, max(rows_for_grid, rows_for_min_block))
    cap = max(align, (bc // align) * align)  # partial final block handled by cdiv grid
    return max(align, min(tile, cap))


def adaptive_instance_norm_2d(x, weight, bias, *, eps=EPS, tile_c=None):
    """x: (B, C, H, W); weight, bias: (B*C,). Returns (B, C, H, W)."""
    B, C, H, W = x.shape
    BC, HW = B * C, H * W
    assert weight.shape == (BC,) and bias.shape == (BC,)

    itemsize = jnp.dtype(x.dtype).itemsize
    align = 8 if itemsize >= 4 else 16
    vmem_cap = int(0.85 * _vmem_capacity_bytes())

    if tile_c is None:
        tile_c = _choose_tile_c(BC, HW, itemsize)
    # Generation-aware safety: shrink the tile until the estimated footprint
    # fits the queried per-core VMEM (v7x: 64 MiB/TC vs 128 MiB on v5e/v6e).
    while tile_c > align and _footprint_bytes(tile_c, HW, itemsize) > vmem_cap:
        tile_c = max(align, (tile_c // 2 // align) * align)
    # TODO(synk): when even one aligned row-group exceeds VMEM (very large H*W,
    # e.g. 1024x1024 f32 on v7x), split HW onto a second "arbitrary" grid axis
    # with (tile_c,1) sum/sumsq accumulators and a finalize+normalize pass.

    grid = pl.cdiv(BC, tile_c)
    bc_pad = grid * tile_c

    # Flattened view; dtype kept through the DMA (bf16 stays bf16).
    # If HW % 128 != 0 (e.g. 56x56) the tail lanes store via vst.msk -- only
    # the last partial vreg per row, not worth host-side padding.
    x2 = x.reshape(BC, HW)
    w2 = weight.astype(jnp.float32)
    b2 = bias.astype(jnp.float32)
    if bc_pad != BC:
        # pad the tiny per-instance params so every (tile_c, 1) param block is
        # fully in-bounds; padded x rows of the last block are discarded on write
        w2 = jnp.pad(w2, (0, bc_pad - BC))
        b2 = jnp.pad(b2, (0, bc_pad - BC))
    w2 = w2.reshape(bc_pad, 1)
    b2 = b2.reshape(bc_pad, 1)

    vmem_limit = int(min(max(_footprint_bytes(tile_c, HW, itemsize), 32 << 20),
                         vmem_cap))

    low_precision_ew = (x.dtype == jnp.bfloat16) and _has_low_precision_vpu()

    # TODO(synk): if xprof shows one v7x TensorCore idle, switch this axis to
    # pltpu.CORE_PARALLEL (or add a leading core-sized axis) to force sharding.
    out2 = pl.pallas_call(
        functools.partial(_adain_kernel, eps=eps, low_precision_ew=low_precision_ew),
        out_shape=jax.ShapeDtypeStruct((BC, HW), x.dtype),
        grid_spec=pltpu.PrefetchScalarGridSpec(
            num_scalar_prefetch=0,
            grid=(grid,),
            in_specs=[
                pl.BlockSpec((tile_c, HW), lambda i: (i, 0)),
                # weight/bias tiled per grid step (lane-padded but tiny blocks)
                pl.BlockSpec((tile_c, 1), lambda i: (i, 0)),
                pl.BlockSpec((tile_c, 1), lambda i: (i, 0)),
            ],
            out_specs=pl.BlockSpec((tile_c, HW), lambda i: (i, 0)),
        ),
        compiler_params=pltpu.CompilerParams(
            dimension_semantics=("parallel",),
            vmem_limit_bytes=vmem_limit,
        ),
    )(x2, w2, b2)

    return out2.reshape(B, C, H, W)


def _reference(x, weight, bias):
    B, C, H, W = x.shape
    xr = x.reshape(B * C, H * W).astype(jnp.float32)
    mean = jnp.mean(xr, axis=-1, keepdims=True)
    var = jnp.mean((xr - mean) ** 2, axis=-1, keepdims=True)
    out = (xr - mean) / jnp.sqrt(var + EPS)
    out = out * weight[:, None] + bias[:, None]
    return out.reshape(B, C, H, W).astype(x.dtype)


if __name__ == "__main__":
    B, C, H, W = 2, 4, 16, 16
    num_features = C

    key = jax.random.PRNGKey(0)
    kx, kw, kb = jax.random.split(key, 3)

    x = jax.random.normal(kx, (B, C, H, W), dtype=jnp.float32)
    # AdaIN weight/bias are assigned externally (e.g. by a style MLP) with
    # shape (B * num_features,) — initialize deterministically here.
    weight = 1.0 + 0.1 * jax.random.normal(kw, (B * num_features,), dtype=jnp.float32)
    bias = 0.1 * jax.random.normal(kb, (B * num_features,), dtype=jnp.float32)

    out = adaptive_instance_norm_2d(x, weight, bias)
    out = jax.block_until_ready(out)

    ref = _reference(x, weight, bias)
    assert out.shape == (B, C, H, W)
    assert jnp.allclose(out, ref, atol=1e-4, rtol=1e-4), "mismatch vs reference"

    # TODO(synk): running_mean/running_var buffer updates (training-mode side
    # effect only, does not affect the forward output) are not emitted.
    print("KERNEL_OK")
</pallas_src>

<mosaic_0001>
module attributes {stable_mosaic.version = 11 : i64} {
  func.func @_adain_kernel(%arg0: i32, %arg1: memref<8x256xf32, #tpu.memory_space<vmem>>, %arg2: memref<8x1xf32, #tpu.memory_space<vmem>>, %arg3: memref<8x1xf32, #tpu.memory_space<vmem>>, %arg4: memref<8x256xf32, #tpu.memory_space<vmem>>) attributes {dimension_semantics = [#tpu.dimension_semantics<parallel>], iteration_bounds = array<i64: 1>, scalar_prefetch = 0 : i64, scratch_operands = 0 : i64, tpu.core_type = #tpu.core_type<tc>, window_params = [{transform_indices = @transform_0, window_bounds = array<i64: 8, 256>}, {transform_indices = @transform_1, window_bounds = array<i64: 8, 1>}, {transform_indices = @transform_2, window_bounds = array<i64: 8, 1>}, {transform_indices = @transform_3, window_bounds = array<i64: 8, 256>}]} {
    %c0 = arith.constant 0 : index
    %c0_0 = arith.constant 0 : index
    %0 = vector.load %arg1[%c0, %c0_0] : memref<8x256xf32, #tpu.memory_space<vmem>>, vector<8x256xf32>
    %cst = arith.constant dense<0.000000e+00> : vector<8xf32>
    %1 = vector.multi_reduction <add>, %0, %cst [1] : vector<8x256xf32> to vector<8xf32>
    %2 = vector.shape_cast %1 : vector<8xf32> to vector<8x1xf32>
    %cst_1 = arith.constant 3.906250e-03 : f32
    %3 = vector.broadcast %cst_1 : f32 to vector<8x1xf32>
    %4 = arith.mulf %2, %3 : vector<8x1xf32>
    %c0_2 = arith.constant 0 : index
    %c0_3 = arith.constant 0 : index
    %5 = vector.load %arg1[%c0_2, %c0_3] : memref<8x256xf32, #tpu.memory_space<vmem>>, vector<8x256xf32>
    %6 = vector.broadcast %4 : vector<8x1xf32> to vector<8x256xf32>
    %7 = arith.subf %5, %6 : vector<8x256xf32>
    %8 = arith.mulf %7, %7 : vector<8x256xf32>
    %cst_4 = arith.constant dense<0.000000e+00> : vector<8xf32>
    %9 = vector.multi_reduction <add>, %8, %cst_4 [1] : vector<8x256xf32> to vector<8xf32>
    %10 = vector.shape_cast %9 : vector<8xf32> to vector<8x1xf32>
    %cst_5 = arith.constant 3.906250e-03 : f32
    %11 = vector.broadcast %cst_5 : f32 to vector<8x1xf32>
    %12 = arith.mulf %10, %11 : vector<8x1xf32>
    %cst_6 = arith.constant 9.99999974E-6 : f32
    %13 = vector.broadcast %cst_6 : f32 to vector<8x1xf32>
    %14 = arith.addf %12, %13 : vector<8x1xf32>
    %15 = math.rsqrt %14 : vector<8x1xf32>
    %c0_7 = arith.constant 0 : index
    %c0_8 = arith.constant 0 : index
    %16 = vector.load %arg2[%c0_7, %c0_8] : memref<8x1xf32, #tpu.memory_space<vmem>>, vector<8x1xf32>
    %17 = arith.mulf %15, %16 : vector<8x1xf32>
    %c0_9 = arith.constant 0 : index
    %c0_10 = arith.constant 0 : index
    %18 = vector.load %arg3[%c0_9, %c0_10] : memref<8x1xf32, #tpu.memory_space<vmem>>, vector<8x1xf32>
    %19 = arith.mulf %4, %17 : vector<8x1xf32>
    %20 = arith.subf %18, %19 : vector<8x1xf32>
    %c0_11 = arith.constant 0 : index
    %c0_12 = arith.constant 0 : index
    %21 = vector.load %arg1[%c0_11, %c0_12] : memref<8x256xf32, #tpu.memory_space<vmem>>, vector<8x256xf32>
    %22 = vector.broadcast %17 : vector<8x1xf32> to vector<8x256xf32>
    %23 = arith.mulf %21, %22 : vector<8x256xf32>
    %24 = vector.broadcast %20 : vector<8x1xf32> to vector<8x256xf32>
    %25 = arith.addf %23, %24 : vector<8x256xf32>
    %c0_13 = arith.constant 0 : index
    %c0_14 = arith.constant 0 : index
    %26 = vector.load %arg4[%c0_13, %c0_14] : memref<8x256xf32, #tpu.memory_space<vmem>>, vector<8x256xf32>
    tpu.vector_store %arg4[%c0_13, %c0_14], %25 {strides = array<i32>} : memref<8x256xf32, #tpu.memory_space<vmem>>, vector<8x256xf32>,
    return
  }
  func.func @transform_0(%arg0: i32) -> (i32, i32) {
    %c0_i32 = arith.constant 0 : i32
    %c0_i32_0 = arith.constant 0 : i32
    return %arg0, %c0_i32 : i32, i32
  }
  func.func @transform_1(%arg0: i32) -> (i32, i32) {
    %c0_i32 = arith.constant 0 : i32
    %c0_i32_0 = arith.constant 0 : i32
    return %arg0, %c0_i32 : i32, i32
  }
  func.func @transform_2(%arg0: i32) -> (i32, i32) {
    %c0_i32 = arith.constant 0 : i32
    %c0_i32_0 = arith.constant 0 : i32
    return %arg0, %c0_i32 : i32, i32
  }
  func.func @transform_3(%arg0: i32) -> (i32, i32) {
    %c0_i32 = arith.constant 0 : i32
    %c0_i32_0 = arith.constant 0 : i32
    return %arg0, %c0_i32 : i32, i32
  }
}

</mosaic_0001>

<bundles_post_ra>
// kernel: tpu_custom_call.1
= control target key start
LH: loop header
LB: loop body
LE: loop exit
PB: predicated region body
PF: predicated region fallthrough
CT: control target
= control target key end

     0   :  { %s131_s0 = inlined_call_operand.vmem [shape: f32[8,256], index: 0, kind: input, shape index: {}]   ;;  %s132_s1 = inlined_call_operand.vmem [shape: f32[8,1], index: 1, kind: input, shape index: {}]   ;;  %s133_s2 = inlined_call_operand.vmem [shape: f32[8,1], index: 2, kind: input, shape index: {}]   ;;  %s134_s3 = inlined_call_operand.hbm [shape: f32[8,256], index: 3, kind: output, shape index: {}]  }
   0x1   :  { %v15_v0 = vld [vmem:[%s131_s0] sm:$0xff]  ;;  %v16_v1 = vld [vmem:[%s131_s0 + $0x8] sm:$0xff] }
   0x2   :  { %8 = vsyncpa [#allocation3], 0  ;;  %v17_v2 = vadd.f32 %v16_v1, %v15_v0  ;;  %v94_v10 = vmov 0   ;;  %v31_v14 = vld [vmem:[%s132_s1] sm:$0xff]  ;;  %s95_s19 = smov [#allocation2]  }
   0x3   :  { %68 = vset.pattern.permute.xlu1 %v94_v10  ;;  %69 = vset.pattern.permute.xlu0 %v94_v10  ;;  %v33_v17 = vld [vmem:[%s133_s2] sm:$0xff]  ;;  %s58_s20 = sshll.u32 %s95_s19, 4  ;;  %s59_s20 = int_to_ptr.vmem [resolvable:$true] %s58_s20 }
   0x4   :  { %18 = vadd.xlane.f32.xlu0 %v17_v2  ;;  %s72_s1 = scalar_lea.vmem %s59_s20, 256  ;;  %p77_p1 = scmp.lt.s32.totalorder %s59_s20, %s59_s20 }
   0x5   :  { %p73_p0 = scmp.ne.s32.totalorder %s59_s20, %s72_s1  ;;  %p78_p2 = scmp.lt.s32.totalorder %s72_s1, %s72_s1 }
   0x7   :  { %p79_p3 = por %p78_p2, %p77_p1 }
   0x9   :  { %p80_p4 = pnand %p79_p3, %p73_p0 }
  0x8d   :  { %v19_v3 = vpop.xlane.xlu0 %18 }
  0x8e   :  { %v20_v4 = vmul.f32 0.00390625, %v19_v3 }
  0x90   :  { %v21_v5 = vsub.f32 %v15_v0, %v20_v4  ;;  %v22_v6 = vsub.f32 %v16_v1, %v20_v4 }
  0x92   :  { %v23_v7 = vmul.f32 %v21_v5, %v21_v5  ;;  %v24_v8 = vmul.f32 %v22_v6, %v22_v6 }
  0x94   :  { %v25_v9 = vadd.f32 %v24_v8, %v23_v7 }
  0x96   :  { %26 = vadd.xlane.f32.xlu0 %v25_v9 }
 0x11f   :  { %v27_v11 = vpop.xlane.xlu0 %26 }
 0x120   :  { %v28_v12 = vmul.f32 0.00390625, %v27_v11 }
 0x122   :  { %v29_v13 = vadd.f32 1e-05, %v28_v12 }
 0x124   :  { %70 = vrsqrt.f32 %v29_v13 }
 0x131   :  { %v71_v15 = vpop.eup %70 }
 0x132   :  { %v32_v16 = vmul.f32 %v71_v15, %v31_v14 }
 0x134   :  { %38 = vperm.xlu1 %68, %v32_v16   ;;  %v34_v18 = vmul.f32 %v32_v16, %v20_v4 }
 0x136   :  { %v35_v19 = vsub.f32 %v33_v17, %v34_v18 }
 0x138   :  { %45 = vperm.xlu1 %68, %v35_v19  }
 0x1af   :  { %v39_v20 = vpop.permute.xlu1 %38 }
 0x1b0   :  { %v41_v21 = vmul.f32 %v39_v20, %v15_v0  ;;  %v42_v22 = vmul.f32 %v39_v20, %v16_v1 }
 0x1b3   :  { %v46_v23 = vpop.permute.xlu1 %45 }
 0x1b4   :  { %v48_v24 = vadd.f32 %v46_v23, %v41_v21  ;;  %v49_v25 = vadd.f32 %v46_v23, %v42_v22 }
 0x1b6   :  { %50 = vst [vmem:[#allocation2] sm:$0xff] %v48_v24  ;;  %51 = vst [vmem:[#allocation2 + $0x8] sm:$0xff] %v49_v25 }
 0x1b7   :  { %83 = shalt.err (!%p80_p4)
}
 0x1b8   :  { %61 = dma.vmem_to_hbm [thread:$0]  %s59_s20, 256, %s134_s3, [#allocation3]  }
 0x1b9   :  { %92 = dma.done.wait [#allocation3], 256  }
 0x1ba   :  { %93 = vsyncadd [#allocation3], 4294967040 }
 0x1bb   :  { %65 = vsyncpa [#allocation3], 1 }

</bundles_post_ra>
